<compile_context>
chip_gen: v5e
topology: v5e:2x2
jax: 0.10.0
libtpu: 0.0.40
codegen_flags: <defaults>
</compile_context>

<pallas_src>
import functools

import jax
import jax.numpy as jnp
from jax import lax
from jax.experimental import pallas as pl
from jax.experimental.pallas import tpu as pltpu

_MIB = 1024 * 1024


def _round_up(x, m):
    return (x + m - 1) // m * m


@functools.lru_cache(maxsize=1)
def _tpu_generation():
    try:
        kind = jax.devices()[0].device_kind.lower()
    except Exception:
        return "default"
    for tag in ("v7", "v6", "v5"):
        if tag in kind:
            return tag
    return "default"


# Per-generation tiling / VMEM budgets.
#   v7x: 64 MiB VMEM per TC -> leave headroom; 2 TCs -> keep >=2 batch tiles
#        so the "parallel" batch axis can shard across cores.
#   v6e: 2x256^2 MXU -> allow 256-row batch tiles; 128 MiB VMEM.
#   v5e: 4x128^2 MXU -> keep 128-row batch tiles; 128 MiB VMEM.
_GEN_CONFIG = {
    "v7": dict(vmem_cap=52 * _MIB, bt_cap=256, min_batch_tiles=2),
    "v6": dict(vmem_cap=100 * _MIB, bt_cap=256, min_batch_tiles=1),
    "v5": dict(vmem_cap=100 * _MIB, bt_cap=128, min_batch_tiles=1),
    "default": dict(vmem_cap=64 * _MIB, bt_cap=128, min_batch_tiles=1),
}


def _pick_batch_tiling(B, bt_cap, min_batch_tiles):
    """Sublane-aligned batch tile with minimal padding; >=min tiles if possible."""
    b8 = _round_up(B, 8)
    nb = pl.cdiv(b8, bt_cap)
    if min_batch_tiles > 1 and B >= 8 * min_batch_tiles:
        nb = max(nb, min_batch_tiles)
    bt = _round_up(pl.cdiv(B, nb), 8)
    return bt, nb * bt, nb


def _pick_time_block(T, bt, ip, op, x_itemsize, budget=6 * _MIB):
    """Timesteps per grid step; shrink so per-buffer x+y blocks stay small."""
    tt = max(1, min(16, T))
    per_step = bt * (ip * x_itemsize + op * 4)
    while tt > 1 and tt * per_step > budget:
        tt -= 1
    return tt


def _rnn_seq_kernel(x_ref, h0_ref, w_in_ref, b_in_ref, wy_ref, by_ref,
                    y_ref, h_out_ref, zx_ref, *, tt, last_s):
    """tt timesteps of the RNN cell for one batch tile.

    Grid = (batch_tiles, time_blocks).  Refs (per grid step):
      x_ref    : (tt, Bt, Ip)  bf16   inputs for this time block
      h0_ref   : (Bt, Hp)      f32    initial hidden state
      w_in_ref : (Hp+Ip, Hp)   bf16   fused [Wh_t ; Wx_t]   (VMEM-resident)
      b_in_ref : (1, Hp)       f32    fused bh + bx
      wy_ref   : (Hp, Op)      bf16   Wy_t                  (VMEM-resident)
      by_ref   : (1, Op)       f32    by
      y_ref    : (tt, Bt, Op)  f32    per-step outputs
      h_out_ref: (Bt, Hp)      f32    final hidden state (written at last real step)
      zx_ref   : (Bt, Hp+Ip)   bf16   fused [h | x] operand + recurrent carry
    """
    hp = h0_ref.shape[-1]
    ip = x_ref.shape[-1]
    tb = pl.program_id(1)
    ntb = pl.num_programs(1)

    @pl.when(tb == 0)
    def _init():
        # Load the initial hidden state into the carry half of the scratch.
        zx_ref[:, pl.ds(0, hp)] = h0_ref[...].astype(zx_ref.dtype)

    def step(s, carry):
        # Stage this timestep's (already bf16) input behind the carried state.
        zx_ref[:, pl.ds(hp, ip)] = x_ref[s]

        # One fused MXU matmul: [h | x] @ [Wh_t ; Wx_t]  (bf16 in, f32 acc).
        pre = jnp.dot(zx_ref[...], w_in_ref[...],
                      preferred_element_type=jnp.float32) + b_in_ref[...]
        # TODO(synk): on v6e/v7x compute tanh in bf16 (EUP bf16 ~2x f32); kept
        # f32 here so the returned state matches the f32 reference bit-closely.
        h_new = jnp.tanh(pre)                       # f32, (Bt, Hp)
        h_c = h_new.astype(zx_ref.dtype)            # bf16 carry / MXU operand
        zx_ref[:, pl.ds(0, hp)] = h_c

        # Output projection.
        y = jnp.dot(h_c, wy_ref[...],
                    preferred_element_type=jnp.float32) + by_ref[...]
        y_ref[s] = y.astype(y_ref.dtype)

        @pl.when((tb == ntb - 1) & (s == last_s))
        def _finalize():
            h_out_ref[...] = h_new.astype(h_out_ref.dtype)

        return carry

    lax.fori_loop(0, tt, step, 0, unroll=True)


def prepare_params(params, compute_dtype=jnp.bfloat16):
    """Fuse + pad the weights ONCE (outside the per-call path)."""
    H = params["wh_t"].shape[0]
    I = params["wx_t"].shape[0]
    O = params["wy_t"].shape[1]
    hp, ip, op = (_round_up(d, 128) for d in (H, I, O))

    w_in = jnp.zeros((hp + ip, hp), jnp.float32)
    w_in = w_in.at[:H, :H].set(params["wh_t"])
    w_in = w_in.at[hp:hp + I, :H].set(params["wx_t"])
    w_in = w_in.astype(compute_dtype)
    b_in = jnp.zeros((1, hp), jnp.float32).at[:, :H].set(
        (params["bh"] + params["bx"]).reshape(1, H))

    wy = jnp.zeros((hp, op), jnp.float32).at[:H, :O].set(
        params["wy_t"]).astype(compute_dtype)
    by = jnp.zeros((1, op), jnp.float32).at[:, :O].set(
        params["by"].reshape(1, O))

    return {"w_in": w_in, "b_in": b_in, "wy": wy, "by": by,
            "out_size": O, "compute_dtype": compute_dtype}


@functools.partial(jax.jit, static_argnames=("out_size", "compute_dtype"))
def _rnn_forward_impl(x_seq, state, w_in, b_in, wy, by, *, out_size,
                      compute_dtype):
    T, B, I = x_seq.shape
    H = state.shape[1]
    O = out_size
    hp = w_in.shape[1]
    ip = w_in.shape[0] - hp
    op = wy.shape[1]

    cfg = _GEN_CONFIG.get(_tpu_generation(), _GEN_CONFIG["default"])
    bt, bp, nb = _pick_batch_tiling(B, cfg["bt_cap"], cfg["min_batch_tiles"])

    x_itemsize = jnp.dtype(compute_dtype).itemsize
    tt = _pick_time_block(T, bt, ip, op, x_itemsize)
    tp = _round_up(T, tt)
    ntb = tp // tt
    last_s = (T - 1) % tt

    # ---- pad activations (skipped entirely when already aligned) -----------
    x_c = x_seq.astype(compute_dtype)
    if (tp, bp, ip) != (T, B, I):
        x_c = jnp.pad(x_c, ((0, tp - T), (0, bp - B), (0, ip - I)))
    h_c = state.astype(jnp.float32)
    if (bp, hp) != (B, H):
        h_c = jnp.pad(h_c, ((0, bp - B), (0, hp - H)))

    # ---- cost / VMEM budgeting ----------------------------------------------
    flops = 2 * tp * bp * (hp + ip) * hp + 2 * tp * bp * hp * op
    transcendentals = tp * bp * hp
    weight_bytes = (w_in.size * w_in.dtype.itemsize
                    + wy.size * wy.dtype.itemsize
                    + b_in.size * 4 + by.size * 4)
    bytes_accessed = (x_c.size * x_itemsize + weight_bytes
                      + tp * bp * op * 4 + 2 * bp * hp * 4)
    block_bytes = (2 * tt * bt * ip * x_itemsize      # x (double-buffered, bf16)
                   + 2 * tt * bt * op * 4             # y (double-buffered)
                   + 4 * bt * hp * 4                  # h0 + h_out blocks
                   + bt * (hp + ip) * x_itemsize)     # zx scratch (bf16)
    # TODO(synk): for H,I ~ 2-4K the resident fused weight alone can exceed
    # v7x's 64 MiB/TC VMEM -- tile w_in/wy along hp on an extra grid axis (and
    # single-buffer the constant-index weight specs) instead of full residency.
    needed = 2 * weight_bytes + block_bytes + 4 * _MIB
    vmem_limit = int(min(max(needed, 32 * _MIB), cfg["vmem_cap"]))

    grid = (nb, ntb)
    kernel = functools.partial(_rnn_seq_kernel, tt=tt, last_s=last_s)

    y_p, h_out_p = pl.pallas_call(
        kernel,
        out_shape=(
            jax.ShapeDtypeStruct((tp, bp, op), jnp.float32),     # y per step
            jax.ShapeDtypeStruct((bp, hp), jnp.float32),         # final state
        ),
        grid=grid,
        in_specs=[
            pl.BlockSpec((tt, bt, ip), lambda b, t: (t, b, 0)),  # x (time-blocked)
            pl.BlockSpec((bt, hp), lambda b, t: (b, 0)),         # h0
            pl.BlockSpec((hp + ip, hp), lambda b, t: (0, 0)),    # fused W (resident)
            pl.BlockSpec((1, hp), lambda b, t: (0, 0)),          # fused bias
            pl.BlockSpec((hp, op), lambda b, t: (0, 0)),         # Wy (resident)
            pl.BlockSpec((1, op), lambda b, t: (0, 0)),          # by
        ],
        out_specs=(
            pl.BlockSpec((tt, bt, op), lambda b, t: (t, b, 0)),  # y
            pl.BlockSpec((bt, hp), lambda b, t: (b, 0)),         # new_state
        ),
        scratch_shapes=[pltpu.VMEM((bt, hp + ip), compute_dtype)],
        compiler_params=pltpu.CompilerParams(
            dimension_semantics=("parallel", "arbitrary"),
            vmem_limit_bytes=vmem_limit),
        cost_estimate=pl.CostEstimate(
            flops=int(flops),
            transcendentals=int(transcendentals),
            bytes_accessed=int(bytes_accessed)),
    )(x_c, h_c, w_in, b_in, wy, by)

    return y_p[:T, :B, :O], h_out_p[:B, :H]


def rnn_forward(x_seq, state, prep):
    """Run T timesteps in one pallas_call.  x_seq: (T, B, I), state: (B, H)."""
    return _rnn_forward_impl(x_seq, state, prep["w_in"], prep["b_in"],
                             prep["wy"], prep["by"],
                             out_size=prep["out_size"],
                             compute_dtype=prep["compute_dtype"])


def rnn_cell(x, state, prep):
    """Original module semantics: one step, (x, state) -> (y, new_state)."""
    y_seq, new_state = rnn_forward(x[jnp.newaxis], state, prep)
    return y_seq[0], new_state


def init_params(key, input_size, output_size, hidden_size):
    """Mirror the PyTorch module init.

    h2h: identity weight, zero bias (per _init_weights).
    x2h / h2y: nn.Linear default init (uniform in +-1/sqrt(fan_in)).
    Weights are stored transposed: (in_features, out_features).
    """
    k1, k2, k3, k4 = jax.random.split(key, 4)

    wh_t = jnp.eye(hidden_size, dtype=jnp.float32)
    bh = jnp.zeros((1, hidden_size), dtype=jnp.float32)

    bound_x = 1.0 / jnp.sqrt(float(input_size))
    wx_t = jax.random.uniform(k1, (input_size, hidden_size), jnp.float32,
                              -bound_x, bound_x)
    bx = jax.random.uniform(k2, (1, hidden_size), jnp.float32, -bound_x, bound_x)

    bound_h = 1.0 / jnp.sqrt(float(hidden_size))
    wy_t = jax.random.uniform(k3, (hidden_size, output_size), jnp.float32,
                              -bound_h, bound_h)
    by = jax.random.uniform(k4, (1, output_size), jnp.float32, -bound_h, bound_h)

    return {"wh_t": wh_t, "bh": bh, "wx_t": wx_t, "bx": bx,
            "wy_t": wy_t, "by": by}


def _reference_cell(x, h, p, compute_dtype):
    """Pure-JAX reference mirroring the kernel's precision (bf16 MXU, f32 acc)."""
    mm = lambda a, b: jnp.dot(a.astype(compute_dtype), b.astype(compute_dtype),
                              preferred_element_type=jnp.float32)
    h_new = jnp.tanh(mm(h, p["wh_t"]) + p["bh"] + mm(x, p["wx_t"]) + p["bx"])
    y = mm(h_new, p["wy_t"]) + p["by"]
    return y, h_new


def _reference_seq(x_seq, h0, p, compute_dtype):
    def step(h, x):
        y, h_new = _reference_cell(x, h, p, compute_dtype)
        return h_new, y
    h_last, ys = jax.lax.scan(step, h0, x_seq)
    return ys, h_last


if __name__ == "__main__":
    B, I, H, O, T = 2, 16, 32, 8, 6

    key = jax.random.PRNGKey(0)
    kp, kx, kh, ks = jax.random.split(key, 4)

    params = init_params(kp, input_size=I, output_size=O, hidden_size=H)
    prep = prepare_params(params)                 # fuse & pad weights ONCE

    x = jax.random.normal(kx, (B, I), dtype=jnp.float32)
    state = jax.random.normal(kh, (B, H), dtype=jnp.float32)

    # --- single step (exact semantics of RNNCell.forward) -------------------
    y, new_state = rnn_cell(x, state, prep)
    jax.block_until_ready((y, new_state))

    y_ref, h_ref = _reference_cell(x, state, params, jnp.bfloat16)
    assert jnp.allclose(y, y_ref, atol=1e-3, rtol=1e-3)
    assert jnp.allclose(new_state, h_ref, atol=1e-3, rtol=1e-3)

    # --- full sequence in one kernel call (weights stay VMEM-resident) ------
    x_seq = jax.random.normal(ks, (T, B, I), dtype=jnp.float32)
    y_seq, h_last = rnn_forward(x_seq, state, prep)
    jax.block_until_ready((y_seq, h_last))

    y_seq_ref, h_last_ref = _reference_seq(x_seq, state, params, jnp.bfloat16)
    assert jnp.allclose(y_seq, y_seq_ref, atol=1e-3, rtol=1e-3)
    assert jnp.allclose(h_last, h_last_ref, atol=1e-3, rtol=1e-3)

    print("KERNEL_OK")
</pallas_src>

<mosaic_0001>
module attributes {stable_mosaic.version = 11 : i64} {
  func.func @_rnn_seq_kernel(%arg0: i32, %arg1: i32, %arg2: memref<1x8x128xbf16, #tpu.memory_space<vmem>>, %arg3: memref<8x128xf32, #tpu.memory_space<vmem>>, %arg4: memref<256x128xbf16, #tpu.memory_space<vmem>>, %arg5: memref<1x128xf32, #tpu.memory_space<vmem>>, %arg6: memref<128x128xbf16, #tpu.memory_space<vmem>>, %arg7: memref<1x128xf32, #tpu.memory_space<vmem>>, %arg8: memref<1x8x128xf32, #tpu.memory_space<vmem>>, %arg9: memref<8x128xf32, #tpu.memory_space<vmem>>, %arg10: memref<8x256xbf16, #tpu.memory_space<vmem>>) attributes {dimension_semantics = [#tpu.dimension_semantics<parallel>, #tpu.dimension_semantics<arbitrary>], iteration_bounds = array<i64: 1, 1>, scalar_prefetch = 0 : i64, scratch_operands = 1 : i64, tpu.core_type = #tpu.core_type<tc>, window_params = [{transform_indices = @transform_0, window_bounds = array<i64: 1, 8, 128>}, {transform_indices = @transform_1, window_bounds = array<i64: 8, 128>}, {pipeline_mode = #tpu.pipeline_mode<synchronous>, transform_indices = @transform_2, window_bounds = array<i64: 256, 128>}, {pipeline_mode = #tpu.pipeline_mode<synchronous>, transform_indices = @transform_3, window_bounds = array<i64: 1, 128>}, {pipeline_mode = #tpu.pipeline_mode<synchronous>, transform_indices = @transform_4, window_bounds = array<i64: 128, 128>}, {pipeline_mode = #tpu.pipeline_mode<synchronous>, transform_indices = @transform_5, window_bounds = array<i64: 1, 128>}, {transform_indices = @transform_6, window_bounds = array<i64: 1, 8, 128>}, {transform_indices = @transform_7, window_bounds = array<i64: 8, 128>}]} {
    %c0_i32 = arith.constant 0 : i32
    %0 = arith.cmpi eq, %arg1, %c0_i32 : i32
    %1 = arith.extui %0 : i1 to i32
    %c0_i32_0 = arith.constant 0 : i32
    %2 = arith.cmpi ne, %1, %c0_i32_0 : i32
    scf.if %2 {
      %c0_22 = arith.constant 0 : index
      %c0_23 = arith.constant 0 : index
      %30 = vector.load %arg3[%c0_22, %c0_23] : memref<8x128xf32, #tpu.memory_space<vmem>>, vector<8x128xf32>
      %31 = arith.truncf %30 : vector<8x128xf32> to vector<8x128xbf16>
      %c0_24 = arith.constant 0 : index
      %c0_25 = arith.constant 0 : index
      %32 = vector.load %arg10[%c0_24, %c0_25] : memref<8x256xbf16, #tpu.memory_space<vmem>>, vector<8x128xbf16>
      tpu.vector_store %arg10[%c0_24, %c0_25], %31 {strides = array<i32>} : memref<8x256xbf16, #tpu.memory_space<vmem>>, vector<8x128xbf16>,
    } else {
    }
    %c0_i32_1 = arith.constant 0 : i32
    %3 = arith.index_cast %c0_i32_1 : i32 to index
    %c0 = arith.constant 0 : index
    %c0_2 = arith.constant 0 : index
    %4 = vector.load %arg2[%3, %c0, %c0_2] : memref<1x8x128xbf16, #tpu.memory_space<vmem>>, vector<1x8x128xbf16>
    %5 = vector.shape_cast %4 : vector<1x8x128xbf16> to vector<8x128xbf16>
    %c0_3 = arith.constant 0 : index
    %c128 = arith.constant 128 : index
    %6 = vector.load %arg10[%c0_3, %c128] : memref<8x256xbf16, #tpu.memory_space<vmem>>, vector<8x128xbf16>
    tpu.vector_store %arg10[%c0_3, %c128], %5 {strides = array<i32>} : memref<8x256xbf16, #tpu.memory_space<vmem>>, vector<8x128xbf16>,
    %c0_4 = arith.constant 0 : index
    %c0_5 = arith.constant 0 : index
    %7 = vector.load %arg10[%c0_4, %c0_5] : memref<8x256xbf16, #tpu.memory_space<vmem>>, vector<8x256xbf16>
    %c0_6 = arith.constant 0 : index
    %c0_7 = arith.constant 0 : index
    %8 = vector.load %arg4[%c0_6, %c0_7] : memref<256x128xbf16, #tpu.memory_space<vmem>>, vector<256x128xbf16>
    %cst = arith.constant dense<0.000000e+00> : vector<8x128xf32>
    %9 = tpu.matmul %7, %8, %cst {dimension_numbers = #tpu.dot_dimension_numbers<[1], [0], [0], [1], [0, 0, 1, 1], [], []>} : vector<8x256xbf16>, vector<256x128xbf16>, vector<8x128xf32> -> vector<8x128xf32>
    %c0_8 = arith.constant 0 : index
    %c0_9 = arith.constant 0 : index
    %10 = vector.load %arg5[%c0_8, %c0_9] : memref<1x128xf32, #tpu.memory_space<vmem>>, vector<1x128xf32>
    %11 = vector.broadcast %10 : vector<1x128xf32> to vector<8x128xf32>
    %12 = arith.addf %9, %11 : vector<8x128xf32>
    %13 = math.tanh %12 : vector<8x128xf32>
    %14 = arith.truncf %13 : vector<8x128xf32> to vector<8x128xbf16>
    %c0_10 = arith.constant 0 : index
    %c0_11 = arith.constant 0 : index
    %15 = vector.load %arg10[%c0_10, %c0_11] : memref<8x256xbf16, #tpu.memory_space<vmem>>, vector<8x128xbf16>
    tpu.vector_store %arg10[%c0_10, %c0_11], %14 {strides = array<i32>} : memref<8x256xbf16, #tpu.memory_space<vmem>>, vector<8x128xbf16>,
    %c0_12 = arith.constant 0 : index
    %c0_13 = arith.constant 0 : index
    %16 = vector.load %arg6[%c0_12, %c0_13] : memref<128x128xbf16, #tpu.memory_space<vmem>>, vector<128x128xbf16>
    %cst_14 = arith.constant dense<0.000000e+00> : vector<8x128xf32>
    %17 = tpu.matmul %14, %16, %cst_14 {dimension_numbers = #tpu.dot_dimension_numbers<[1], [0], [0], [1], [0, 0, 1, 1], [], []>} : vector<8x128xbf16>, vector<128x128xbf16>, vector<8x128xf32> -> vector<8x128xf32>
    %c0_15 = arith.constant 0 : index
    %c0_16 = arith.constant 0 : index
    %18 = vector.load %arg7[%c0_15, %c0_16] : memref<1x128xf32, #tpu.memory_space<vmem>>, vector<1x128xf32>
    %19 = vector.broadcast %18 : vector<1x128xf32> to vector<8x128xf32>
    %20 = arith.addf %17, %19 : vector<8x128xf32>
    %21 = arith.index_cast %c0_i32_1 : i32 to index
    %c0_17 = arith.constant 0 : index
    %c0_18 = arith.constant 0 : index
    %22 = vector.load %arg8[%21, %c0_17, %c0_18] : memref<1x8x128xf32, #tpu.memory_space<vmem>>, vector<1x8x128xf32>
    %23 = vector.shape_cast %22 : vector<1x8x128xf32> to vector<8x128xf32>
    %24 = vector.shape_cast %20 : vector<8x128xf32> to vector<1x8x128xf32>
    tpu.vector_store %arg8[%21, %c0_17, %c0_18], %24 {strides = array<i32>} : memref<1x8x128xf32, #tpu.memory_space<vmem>>, vector<1x8x128xf32>,
    %c0_i32_19 = arith.constant 0 : i32
    %25 = arith.cmpi eq, %arg1, %c0_i32_19 : i32
    %c0_i32_20 = arith.constant 0 : i32
    %26 = arith.cmpi eq, %c0_i32_1, %c0_i32_20 : i32
    %27 = arith.andi %25, %26 : i1
    %28 = arith.extui %27 : i1 to i32
    %c0_i32_21 = arith.constant 0 : i32
    %29 = arith.cmpi ne, %28, %c0_i32_21 : i32
    scf.if %29 {
      %c0_22 = arith.constant 0 : index
      %c0_23 = arith.constant 0 : index
      %30 = vector.load %arg9[%c0_22, %c0_23] : memref<8x128xf32, #tpu.memory_space<vmem>>, vector<8x128xf32>
      tpu.vector_store %arg9[%c0_22, %c0_23], %13 {strides = array<i32>} : memref<8x128xf32, #tpu.memory_space<vmem>>, vector<8x128xf32>,
    } else {
    }
    %c1_i32 = arith.constant 1 : i32
    return
  }
  func.func @transform_0(%arg0: i32, %arg1: i32) -> (i32, i32, i32) {
    %c0_i32 = arith.constant 0 : i32
    %c0_i32_0 = arith.constant 0 : i32
    return %arg1, %arg0, %c0_i32 : i32, i32, i32
  }
  func.func @transform_1(%arg0: i32, %arg1: i32) -> (i32, i32) {
    %c0_i32 = arith.constant 0 : i32
    %c0_i32_0 = arith.constant 0 : i32
    return %arg0, %c0_i32 : i32, i32
  }
  func.func @transform_2(%arg0: i32, %arg1: i32) -> (i32, i32) {
    %c0_i32 = arith.constant 0 : i32
    %c0_i32_0 = arith.constant 0 : i32
    %c0_i32_1 = arith.constant 0 : i32
    return %c0_i32, %c0_i32_0 : i32, i32
  }
  func.func @transform_3(%arg0: i32, %arg1: i32) -> (i32, i32) {
    %c0_i32 = arith.constant 0 : i32
    %c0_i32_0 = arith.constant 0 : i32
    %c0_i32_1 = arith.constant 0 : i32
    return %c0_i32, %c0_i32_0 : i32, i32
  }
  func.func @transform_4(%arg0: i32, %arg1: i32) -> (i32, i32) {
    %c0_i32 = arith.constant 0 : i32
    %c0_i32_0 = arith.constant 0 : i32
    %c0_i32_1 = arith.constant 0 : i32
    return %c0_i32, %c0_i32_0 : i32, i32
  }
  func.func @transform_5(%arg0: i32, %arg1: i32) -> (i32, i32) {
    %c0_i32 = arith.constant 0 : i32
    %c0_i32_0 = arith.constant 0 : i32
    %c0_i32_1 = arith.constant 0 : i32
    return %c0_i32, %c0_i32_0 : i32, i32
  }
  func.func @transform_6(%arg0: i32, %arg1: i32) -> (i32, i32, i32) {
    %c0_i32 = arith.constant 0 : i32
    %c0_i32_0 = arith.constant 0 : i32
    return %arg1, %arg0, %c0_i32 : i32, i32, i32
  }
  func.func @transform_7(%arg0: i32, %arg1: i32) -> (i32, i32) {
    %c0_i32 = arith.constant 0 : i32
    %c0_i32_0 = arith.constant 0 : i32
    return %arg0, %c0_i32 : i32, i32
  }
}

</mosaic_0001>

<bundles_post_ra>
// kernel: _rnn_forward_impl.1
= control target key start
LH: loop header
LB: loop body
LE: loop exit
PB: predicated region body
PF: predicated region fallthrough
CT: control target
= control target key end

     0   :  { %13 = vsyncpa [#allocation4], 0  ;;  %s579_s0 = inlined_call_operand.vmem [shape: bf16[1,8,128], index: 0, kind: input, shape index: {}]   ;;  %s580_s1 = inlined_call_operand.vmem [shape: f32[8,128], index: 1, kind: input, shape index: {}]   ;;  %s581_s2 = inlined_call_operand.hbm [shape: bf16[256,128], index: 2, kind: input, shape index: {}]   ;;  %s582_s3 = inlined_call_operand.vmem [shape: f32[1,128], index: 3, kind: input, shape index: {}]   ;;  %s583_s4 = inlined_call_operand.hbm [shape: bf16[128,128], index: 4, kind: input, shape index: {}]   ;;  %s584_s5 = inlined_call_operand.vmem [shape: f32[1,128], index: 5, kind: input, shape index: {}]   ;;  %s585_s6 = inlined_call_operand.vmem [shape: f32[1,8,128], index: 6, kind: output, shape index: {0}]   ;;  %s586_s7 = inlined_call_operand.vmem [shape: f32[8,128], index: 7, kind: output, shape index: {1}]  }
   0x1   :  { %s23_s26 = sshll.u32 %s581_s2, 4  ;;  %s24_s26 = int_to_ptr.hbm [resolvable:$true] %s23_s26 }
   0x2   :  { %14 = vsyncpa [#allocation6], 0  ;;  %s511_s27 = smov [#allocation3]   ;;  %s38_s8 = sshll.u32 %s583_s4, 4  ;;  %s39_s8 = int_to_ptr.hbm [resolvable:$true] %s38_s8 }
   0x3   :  { %s25_s28 = sshll.u32 %s511_s27, 4  ;;  %s512_s9 = smov 64   ;;  %s26_s28 = int_to_ptr.vmem [resolvable:$true] %s25_s28 }
   0x4   :  { %s513_s10 = smov 4   ;;  %s514_s11 = smov [#allocation5]  }
   0x5   :  { %31 = dma.hbm_to_vmem [thread:$0]  %s24_s26, 2048, %s26_s28, [#allocation4], %s512_s9, %s512_s9, %s513_s10  }
   0x6   :  { %s40_s12 = sshll.u32 %s514_s11, 4  ;;  %s41_s12 = int_to_ptr.vmem [resolvable:$true] %s40_s12 }
   0x7   :  { %46 = dma.hbm_to_vmem [thread:$0]  %s39_s8, 1024, %s41_s12, [#allocation6], %s512_s9, %s512_s9, %s513_s10  }
   0x8   :  { %507 = dma.done.wait [#allocation4], 2048  }
   0x9   :  { %508 = vsyncadd [#allocation4], 4294965248 }
   0xa   :  { %509 = dma.done.wait [#allocation6], 1024  }
   0xb   :  { %510 = vsyncadd [#allocation6], 4294966272  ;;  %v434_v0 = vld [vmem:[#allocation3 + $0x38] sm:$0xff]  ;;  %v433_v2 = vld [vmem:[#allocation3 + $0x30] sm:$0xff] }
   0xc   :  { %v442_v1 = vld [vmem:[#allocation3 + $0x78] sm:$0xff]  ;;  %206 = vmatpush.bf16.msra.mxu0 %v434_v0  ;;  %v441_v3 = vld [vmem:[#allocation3 + $0x70] sm:$0xff]  ;;  %v432_v6 = vld [vmem:[#allocation3 + $0x28] sm:$0xff] }
   0xd   :  { %219 = vmatpush.bf16.msra.mxu1 %v442_v1  ;;  %v61_v4 = vld [vmem:[%s580_s1] sm:$0xff]  ;;  %v440_v7 = vld [vmem:[#allocation3 + $0x68] sm:$0xff]  ;;  %v449_v10 = vld [vmem:[#allocation5 + $0x30] sm:$0xff] }
   0xe   :  { %v64_v5 = vld [vmem:[%s579_s0] sm:$0xf]  ;;  %v62_v8 = vpack.c.bf16 %v61_v4, %v61_v4  ;;  %v431_v11 = vld [vmem:[#allocation3 + $0x20] sm:$0xff]  ;;  %v448_v13 = vld [vmem:[#allocation5 + $0x28] sm:$0xff] }
   0xf   :  { %65 = vst [vmem:[#allocation2 + $0x4] sm:$0xf] %v64_v5  ;;  %v450_v9 = vld [vmem:[#allocation5 + $0x38] sm:$0xff]  ;;  %v439_v12 = vld [vmem:[#allocation3 + $0x60] sm:$0xff]  ;;  %v429_v17 = vld [vmem:[#allocation3 + $0x10] sm:$0xff] }
  0x10   :  { %207 = vmatpush.bf16.msra.mxu0 %v433_v2  ;;  %63 = vst [vmem:[#allocation2] sm:$0xf] %v62_v8  ;;  %303 = vmatpush.bf16.msra.mxu2 %v450_v9  ;;  %v430_v14 = vld [vmem:[#allocation3 + $0x18] sm:$0xff]  ;;  %v447_v16 = vld [vmem:[#allocation5 + $0x20] sm:$0xff]  ;;  %v437_v18 = vld [vmem:[#allocation3 + $0x50] sm:$0xff] }
  0x11   :  { %220 = vmatpush.bf16.msra.mxu1 %v441_v3  ;;  %v438_v15 = vld [vmem:[#allocation3 + $0x58] sm:$0xff]  ;;  %v428_v20 = vld [vmem:[#allocation3 + $0x8] sm:$0xff]  ;;  %v427_v25 = vld [vmem:[#allocation3] sm:$0xff] }
  0x12   :  { %v446_v19 = vld [vmem:[#allocation5 + $0x18] sm:$0xff]  ;;  %v436_v21 = vld [vmem:[#allocation3 + $0x48] sm:$0xff]  ;;  %v435_v26 = vld [vmem:[#allocation3 + $0x40] sm:$0xff] }
  0x13   :  { %v445_v29 = vld [vmem:[#allocation5 + $0x10] sm:$0xff]  ;;  %v444_v30 = vld [vmem:[#allocation5 + $0x8] sm:$0xff]  ;;  %v443_v31 = vld [vmem:[#allocation5] sm:$0xff] }
  0x14   :  { %208 = vmatpush.bf16.msra.mxu0 %v432_v6  ;;  %304 = vmatpush.bf16.msra.mxu2 %v449_v10  ;;  %v455_v32 = vld [vmem:[%s582_s3] ss:$0 sm:$0xff] }
  0x15   :  { %221 = vmatpush.bf16.msra.mxu1 %v440_v7  ;;  %v456_v41 = vld [vmem:[%s584_s5] ss:$0 sm:$0xff] }
  0x17   :  { %v66_v22 = vld [vmem:[#allocation2] sm:$0xff] }
  0x18   :  { %209 = vmatpush.bf16.msra.mxu0 %v431_v11  ;;  %305 = vmatpush.bf16.msra.mxu2 %v448_v13  ;;  %v104_v23 = vunpack.c.l.b16 %v66_v22  ;;  %v105_v24 = vunpack.c.h.b16 %v66_v22 }
  0x19   :  { %222 = vmatpush.bf16.msra.mxu1 %v439_v12 }
  0x1a   :  { %v106_v27 = vpack.c.b16 %v104_v23, %v104_v23  ;;  %v107_v28 = vpack.c.b16 %v105_v24, %v105_v24 }
  0x1c   :  { %210 = vmatpush.bf16.msra.mxu0 %v430_v14  ;;  %306 = vmatpush.bf16.msra.mxu2 %v447_v16 }
  0x1d   :  { %223 = vmatpush.bf16.msra.mxu1 %v438_v15 }
  0x20   :  { %211 = vmatpush.bf16.msra.mxu0 %v429_v17  ;;  %307 = vmatpush.bf16.msra.mxu2 %v446_v19 }
  0x21   :  { %224 = vmatpush.bf16.msra.mxu1 %v437_v18 }
  0x24   :  { %212 = vmatpush.bf16.msra.mxu0 %v428_v20  ;;  %308 = vmatpush.bf16.msra.mxu2 %v445_v29 }
  0x25   :  { %225 = vmatpush.bf16.msra.mxu1 %v436_v21 }
  0x28   :  { %213 = vmatpush.bf16.msra.mxu0 %v427_v25  ;;  %309 = vmatpush.bf16.msra.mxu2 %v444_v30 }
  0x29   :  { %226 = vmatpush.bf16.msra.mxu1 %v435_v26 }
  0x2b   :  { %214 = vmatmul.bf16.vlgmr.msra.gmra.mxu0 %v106_v27 }
  0x2c   :  { %227 = vmatmul.bf16.vlgmr.msra.gmra.mxu1 %v107_v28  ;;  %310 = vmatpush.bf16.msra.mxu2 %v443_v31 }
  0xa8   :  { %v215_v33 = vpop.f32.mrf.mxu0 }
  0xa9   :  { %v228_v34 = vpop.f32.mrf.mxu1  ;;  %v216_v35 = vadd.f32 %v455_v32, %v215_v33 }
  0xab   :  { %v229_v36 = vadd.f32 %v228_v34, %v216_v35 }
  0xad   :  { %457 = vtanh.f32 %v229_v36 }
  0xb0   :  { %v217_v37 = vpop.f32.mrf.mxu0 }
  0xb1   :  { %v230_v38 = vpop.f32.mrf.mxu1 }
  0xb3   :  { %v458_v39 = vpop.eup %457 }
  0xb4   :  { %320 = vst [vmem:[%s586_s7] sm:$0xff] %v458_v39  ;;  %v233_v40 = vpack.c.bf16 %v458_v39, %v458_v39 }
  0xb6   :  { %234 = vst [vmem:[#allocation2] sm:$0xf] %v233_v40  ;;  %311 = vmatmul.bf16.vlgmr.msra.gmra.mxu2 %v233_v40 }
 0x139   :  { %v312_v42 = vpop.f32.mrf.mxu2 }
 0x13a   :  { %v313_v43 = vadd.f32 %v456_v41, %v312_v42 }
 0x13c   :  { %316 = vst [vmem:[%s585_s6] sm:$0xff] %v313_v43 }
 0x141   :  { %v314_v44 = vpop.f32.mrf.mxu2 }
 0x142   :  { %329 = vsyncpa [#allocation4], 1 }
 0x143   :  { %330 = vsyncpa [#allocation6], 1 }

</bundles_post_ra>
